<compile_context>
chip_gen: v5e
topology: v5e:2x2
jax: 0.10.0
libtpu: 0.0.40
codegen_flags: <defaults>
</compile_context>

<pallas_src>
import jax
import jax.numpy as jnp
from jax.experimental import pallas as pl
from jax.experimental.pallas import tpu as pltpu


def _round_up(v, m):
    return ((v + m - 1) // m) * m


def sgconv_kernel(a_ref, xw_ref, b1_ref, wc_ref, bc_ref, y_ref,
                  logits_ref, feat_ref, loss_ref, acc_ref):
    """Grid = (row tiles of A, k tiles of A).  Accumulate A_norm @ (X W1^T)
    over k; on the last k step add the SGConv bias, run the classifier head
    and the per-node cross-entropy."""
    k = pl.program_id(1)
    nk = pl.num_programs(1)

    @pl.when(k == 0)
    def _():
        acc_ref[...] = jnp.zeros_like(acc_ref)

    # One MXU matmul per grid step; both operands bf16, f32 accumulation.
    acc_ref[...] += jnp.dot(a_ref[...], xw_ref[...],
                            preferred_element_type=jnp.float32)

    @pl.when(k == nk - 1)
    def _():
        h = acc_ref[...] + b1_ref[...]                       # (tm, Hp) f32
        feat_ref[...] = h                                    # lane-dense store

        logits = jnp.dot(h.astype(jnp.bfloat16), wc_ref[...],
                         preferred_element_type=jnp.float32) + bc_ref[...]
        logits_ref[...] = logits                             # (tm, Lp), Lp = 128k

        # per-node CE: logsumexp(logits) - logit[y]; padded classes carry a
        # -1e30 bias so exp() kills them and y < num_label never selects them.
        m = jnp.max(logits, axis=-1, keepdims=True)
        lse = m + jnp.log(jnp.sum(jnp.exp(logits - m), axis=-1, keepdims=True))
        cls = jax.lax.broadcasted_iota(jnp.int32, logits.shape, 1)
        onehot = (cls == y_ref[...]).astype(jnp.float32)
        true_logit = jnp.sum(logits * onehot, axis=-1, keepdims=True)
        # Padded rows produce a finite garbage value here; they are sliced off
        # outside the kernel (no program_id-based masking inside pl.when).
        loss_ref[...] = lse - true_logit


def sgconv_forward(x, edge_index, y, w1, b1, wc, bc):
    """Pallas implementation of SGConvModel.forward:
       h = SGConv(x, edge_index); logits = classify(h); loss = CE(logits, y)."""
    N, input_dim = x.shape
    hidden_dim = w1.shape[0]
    num_label = wc.shape[0]

    # --- glue: dense normalized adjacency (PyG gcn_norm with self-loops) ---
    # TODO(synk): for production graph sizes keep CSR (row_ptr/col_idx/edge_norm)
    # + scalar-prefetch gathers instead of densifying to O(N^2); optionally
    # quantize A to int8 (v5e/v6e) / fp8 (v7x) to halve the dominant HBM stream.
    row, col = edge_index[0], edge_index[1]
    A = jnp.zeros((N, N), jnp.float32).at[col, row].add(1.0)
    A = A + jnp.eye(N, dtype=jnp.float32)
    deg = A.sum(axis=1)
    dinv = jnp.where(deg > 0, deg ** -0.5, 0.0)
    A_norm = dinv[:, None] * A * dinv[None, :]

    # --- hoist the SGConv linear: XW = X @ W1^T (one XLA matmul, f32) ---
    xw = x.astype(jnp.float32) @ w1.astype(jnp.float32).T          # (N, hidden)

    # --- padding / layout prep (lane-dense: everything a multiple of 128) ---
    Hp = _round_up(max(hidden_dim, 128), 128)
    Lp = _round_up(max(num_label, 128), 128)
    N128 = _round_up(N, 128)
    if N128 <= 2048:
        N_pad = N128
        tk = N_pad                                  # one k step, longest A DMA rows
        tm = N_pad if N_pad <= 128 else N_pad // 2  # >=2 row tiles -> v7x megacore
    else:
        N_pad = _round_up(N, 1024)
        tk = 1024
        tm = 512

    A_p = jnp.zeros((N_pad, N_pad), jnp.bfloat16).at[:N, :N].set(
        A_norm.astype(jnp.bfloat16))
    xw_p = jnp.zeros((N_pad, Hp), jnp.bfloat16).at[:N, :hidden_dim].set(
        xw.astype(jnp.bfloat16))
    y_p = jnp.zeros((N_pad, 1), jnp.int32).at[:N, 0].set(y.astype(jnp.int32))

    b1r = jnp.zeros((1, Hp), jnp.float32).at[0, :hidden_dim].set(
        b1.astype(jnp.float32))
    wct = jnp.zeros((Hp, Lp), jnp.bfloat16).at[:hidden_dim, :num_label].set(
        wc.T.astype(jnp.bfloat16))
    bcr = jnp.full((1, Lp), -1e30, jnp.float32).at[0, :num_label].set(
        bc.astype(jnp.float32))

    grid = (N_pad // tm, N_pad // tk)

    # VMEM budget from the actual buffer sizes (double-buffered streams +
    # scratch) with headroom — never the full 64 MiB of a v7x core.
    vmem_bytes = (2 * tm * tk * 2                       # A tiles, bf16
                  + 2 * tk * Hp * 2                     # XW tiles, bf16
                  + 2 * (tm * Lp + tm * Hp + tm) * 4    # logits / feats / loss
                  + 2 * tm * 4                          # labels
                  + 2 * (Hp * Lp * 2 + Hp * 4 + Lp * 4)  # weights / biases
                  + tm * Hp * 4)                        # accumulator scratch
    vmem_limit = min(max(int(vmem_bytes * 1.5) + (2 << 20), 8 << 20), 48 << 20)

    logits_p, feats_p, loss_nodes = pl.pallas_call(
        sgconv_kernel,
        out_shape=(
            jax.ShapeDtypeStruct((N_pad, Lp), jnp.float32),
            jax.ShapeDtypeStruct((N_pad, Hp), jnp.float32),
            jax.ShapeDtypeStruct((N_pad, 1), jnp.float32),
        ),
        grid_spec=pltpu.PrefetchScalarGridSpec(
            num_scalar_prefetch=0,
            grid=grid,
            in_specs=[
                pl.BlockSpec((tm, tk), lambda i, k: (i, k)),        # A_norm
                pl.BlockSpec((tk, Hp), lambda i, k: (k, 0)),        # XW
                pl.BlockSpec((1, Hp), lambda i, k: (0, 0)),         # b1
                pl.BlockSpec((Hp, Lp), lambda i, k: (0, 0)),        # Wc^T
                pl.BlockSpec((1, Lp), lambda i, k: (0, 0)),         # bc
                pl.BlockSpec((tm, 1), lambda i, k: (i, 0)),         # labels
            ],
            out_specs=(
                pl.BlockSpec((tm, Lp), lambda i, k: (i, 0)),        # logits
                pl.BlockSpec((tm, Hp), lambda i, k: (i, 0)),        # feats
                pl.BlockSpec((tm, 1), lambda i, k: (i, 0)),         # per-node CE
            ),
            scratch_shapes=[pltpu.VMEM((tm, Hp), jnp.float32)],
        ),
        compiler_params=pltpu.CompilerParams(
            dimension_semantics=("parallel", "arbitrary"),
            vmem_limit_bytes=vmem_limit,
        ),
    )(A_p, xw_p, b1r, wct, bcr, y_p)

    logits = logits_p[:N, :num_label]
    feats = feats_p[:N, :hidden_dim]
    # Padded rows are excluded by slicing; tiny mean done outside the kernel so
    # the row-tile grid axis stays "parallel" (megacore-safe).
    loss = jnp.mean(loss_nodes[:N, 0])
    return logits, loss, feats


if __name__ == "__main__":
    key = jax.random.PRNGKey(0)
    N, E = 16, 48
    input_dim, hidden_dim, num_label = 16, 32, 6

    k1, k2, k3, k4, k5 = jax.random.split(key, 5)
    x = jax.random.normal(k1, (N, input_dim), jnp.float32)
    edge_index = jax.random.randint(k2, (2, E), 0, N)
    y = jax.random.randint(k3, (N,), 0, num_label)

    # deterministic glorot-style parameter init (shapes from module __init__)
    w1 = jax.random.uniform(k4, (hidden_dim, input_dim), jnp.float32, -1.0, 1.0) \
        * (6.0 / (hidden_dim + input_dim)) ** 0.5       # gat1 (SGConv) lin weight
    b1 = jnp.zeros((hidden_dim,), jnp.float32)          # gat1 lin bias
    wc = jax.random.uniform(k5, (num_label, hidden_dim), jnp.float32, -1.0, 1.0) \
        * (6.0 / (num_label + hidden_dim)) ** 0.5       # classify weight
    bc = jnp.zeros((num_label,), jnp.float32)           # classify bias

    logits, loss, feats = sgconv_forward(x, edge_index, y, w1, b1, wc, bc)
    jax.block_until_ready((logits, loss, feats))

    assert logits.shape == (N, num_label)
    assert feats.shape == (N, hidden_dim)
    assert loss.shape == ()

    # pure-JAX f32 reference (bf16 propagation => loose tolerance)
    row, col = edge_index[0], edge_index[1]
    A = jnp.zeros((N, N), jnp.float32).at[col, row].add(1.0) + jnp.eye(N)
    dinv = jnp.where(A.sum(1) > 0, A.sum(1) ** -0.5, 0.0)
    A_norm = dinv[:, None] * A * dinv[None, :]
    h_ref = (A_norm @ x) @ w1.T + b1
    logit_ref = h_ref @ wc.T + bc
    lse = jax.nn.logsumexp(logit_ref, axis=-1)
    loss_ref = jnp.mean(lse - logit_ref[jnp.arange(N), y])
    assert jnp.allclose(feats, h_ref, rtol=5e-2, atol=5e-2)
    assert jnp.allclose(logits, logit_ref, rtol=5e-2, atol=5e-2)
    assert jnp.abs(loss - loss_ref) < 5e-2

    print("KERNEL_OK")
</pallas_src>

<mosaic_0001>
module attributes {stable_mosaic.version = 11 : i64} {
  func.func @sgconv_kernel(%arg0: i32, %arg1: i32, %arg2: memref<128x128xbf16, #tpu.memory_space<vmem>>, %arg3: memref<128x128xbf16, #tpu.memory_space<vmem>>, %arg4: memref<1x128xf32, #tpu.memory_space<vmem>>, %arg5: memref<128x128xbf16, #tpu.memory_space<vmem>>, %arg6: memref<1x128xf32, #tpu.memory_space<vmem>>, %arg7: memref<128x1xi32, #tpu.memory_space<vmem>>, %arg8: memref<128x128xf32, #tpu.memory_space<vmem>>, %arg9: memref<128x128xf32, #tpu.memory_space<vmem>>, %arg10: memref<128x1xf32, #tpu.memory_space<vmem>>, %arg11: memref<128x128xf32, #tpu.memory_space<vmem>>) attributes {dimension_semantics = [#tpu.dimension_semantics<parallel>, #tpu.dimension_semantics<arbitrary>], iteration_bounds = array<i64: 1, 1>, scalar_prefetch = 0 : i64, scratch_operands = 1 : i64, tpu.core_type = #tpu.core_type<tc>, window_params = [{transform_indices = @transform_0, window_bounds = array<i64: 128, 128>}, {transform_indices = @transform_1, window_bounds = array<i64: 128, 128>}, {pipeline_mode = #tpu.pipeline_mode<synchronous>, transform_indices = @transform_2, window_bounds = array<i64: 1, 128>}, {pipeline_mode = #tpu.pipeline_mode<synchronous>, transform_indices = @transform_3, window_bounds = array<i64: 128, 128>}, {pipeline_mode = #tpu.pipeline_mode<synchronous>, transform_indices = @transform_4, window_bounds = array<i64: 1, 128>}, {transform_indices = @transform_5, window_bounds = array<i64: 128, 1>}, {transform_indices = @transform_6, window_bounds = array<i64: 128, 128>}, {transform_indices = @transform_7, window_bounds = array<i64: 128, 128>}, {transform_indices = @transform_8, window_bounds = array<i64: 128, 1>}]} {
    %c0_i32 = arith.constant 0 : i32
    %0 = arith.cmpi eq, %arg1, %c0_i32 : i32
    %1 = arith.extui %0 : i1 to i32
    %c0_i32_0 = arith.constant 0 : i32
    %2 = arith.cmpi ne, %1, %c0_i32_0 : i32
    scf.if %2 {
      %cst_10 = arith.constant 0.000000e+00 : f32
      %12 = vector.broadcast %cst_10 : f32 to vector<128x128xf32>
      %c0_11 = arith.constant 0 : index
      %c0_12 = arith.constant 0 : index
      %13 = vector.load %arg11[%c0_11, %c0_12] : memref<128x128xf32, #tpu.memory_space<vmem>>, vector<128x128xf32>
      tpu.vector_store %arg11[%c0_11, %c0_12], %12 {strides = array<i32>} : memref<128x128xf32, #tpu.memory_space<vmem>>, vector<128x128xf32>,
    } else {
    }
    %c0 = arith.constant 0 : index
    %c0_1 = arith.constant 0 : index
    %3 = vector.load %arg11[%c0, %c0_1] : memref<128x128xf32, #tpu.memory_space<vmem>>, vector<128x128xf32>
    %c0_2 = arith.constant 0 : index
    %c0_3 = arith.constant 0 : index
    %4 = vector.load %arg2[%c0_2, %c0_3] : memref<128x128xbf16, #tpu.memory_space<vmem>>, vector<128x128xbf16>
    %c0_4 = arith.constant 0 : index
    %c0_5 = arith.constant 0 : index
    %5 = vector.load %arg3[%c0_4, %c0_5] : memref<128x128xbf16, #tpu.memory_space<vmem>>, vector<128x128xbf16>
    %cst = arith.constant dense<0.000000e+00> : vector<128x128xf32>
    %6 = tpu.matmul %4, %5, %cst {dimension_numbers = #tpu.dot_dimension_numbers<[1], [0], [0], [1], [0, 0, 1, 1], [], []>} : vector<128x128xbf16>, vector<128x128xbf16>, vector<128x128xf32> -> vector<128x128xf32>
    %7 = arith.addf %3, %6 : vector<128x128xf32>
    %c0_6 = arith.constant 0 : index
    %c0_7 = arith.constant 0 : index
    %8 = vector.load %arg11[%c0_6, %c0_7] : memref<128x128xf32, #tpu.memory_space<vmem>>, vector<128x128xf32>
    tpu.vector_store %arg11[%c0_6, %c0_7], %7 {strides = array<i32>} : memref<128x128xf32, #tpu.memory_space<vmem>>, vector<128x128xf32>,
    %c0_i32_8 = arith.constant 0 : i32
    %9 = arith.cmpi eq, %arg1, %c0_i32_8 : i32
    %10 = arith.extui %9 : i1 to i32
    %c0_i32_9 = arith.constant 0 : i32
    %11 = arith.cmpi ne, %10, %c0_i32_9 : i32
    scf.if %11 {
      %c0_10 = arith.constant 0 : index
      %c0_11 = arith.constant 0 : index
      %12 = vector.load %arg11[%c0_10, %c0_11] : memref<128x128xf32, #tpu.memory_space<vmem>>, vector<128x128xf32>
      %c0_12 = arith.constant 0 : index
      %c0_13 = arith.constant 0 : index
      %13 = vector.load %arg4[%c0_12, %c0_13] : memref<1x128xf32, #tpu.memory_space<vmem>>, vector<1x128xf32>
      %14 = vector.broadcast %13 : vector<1x128xf32> to vector<128x128xf32>
      %15 = arith.addf %12, %14 : vector<128x128xf32>
      %c0_14 = arith.constant 0 : index
      %c0_15 = arith.constant 0 : index
      %16 = vector.load %arg9[%c0_14, %c0_15] : memref<128x128xf32, #tpu.memory_space<vmem>>, vector<128x128xf32>
      tpu.vector_store %arg9[%c0_14, %c0_15], %15 {strides = array<i32>} : memref<128x128xf32, #tpu.memory_space<vmem>>, vector<128x128xf32>,
      %17 = arith.truncf %15 : vector<128x128xf32> to vector<128x128xbf16>
      %c0_16 = arith.constant 0 : index
      %c0_17 = arith.constant 0 : index
      %18 = vector.load %arg5[%c0_16, %c0_17] : memref<128x128xbf16, #tpu.memory_space<vmem>>, vector<128x128xbf16>
      %cst_18 = arith.constant dense<0.000000e+00> : vector<128x128xf32>
      %19 = tpu.matmul %17, %18, %cst_18 {dimension_numbers = #tpu.dot_dimension_numbers<[1], [0], [0], [1], [0, 0, 1, 1], [], []>} : vector<128x128xbf16>, vector<128x128xbf16>, vector<128x128xf32> -> vector<128x128xf32>
      %c0_19 = arith.constant 0 : index
      %c0_20 = arith.constant 0 : index
      %20 = vector.load %arg6[%c0_19, %c0_20] : memref<1x128xf32, #tpu.memory_space<vmem>>, vector<1x128xf32>
      %21 = vector.broadcast %20 : vector<1x128xf32> to vector<128x128xf32>
      %22 = arith.addf %19, %21 : vector<128x128xf32>
      %c0_21 = arith.constant 0 : index
      %c0_22 = arith.constant 0 : index
      %23 = vector.load %arg8[%c0_21, %c0_22] : memref<128x128xf32, #tpu.memory_space<vmem>>, vector<128x128xf32>
      tpu.vector_store %arg8[%c0_21, %c0_22], %22 {strides = array<i32>} : memref<128x128xf32, #tpu.memory_space<vmem>>, vector<128x128xf32>,
      %cst_23 = arith.constant dense<0xFF800000> : vector<128xf32>
      %24 = vector.multi_reduction <maximumf>, %22, %cst_23 [1] : vector<128x128xf32> to vector<128xf32>
      %25 = vector.shape_cast %24 : vector<128xf32> to vector<128x1xf32>
      %26 = vector.broadcast %25 : vector<128x1xf32> to vector<128x128xf32>
      %27 = arith.subf %22, %26 : vector<128x128xf32>
      %28 = math.exp %27 : vector<128x128xf32>
      %cst_24 = arith.constant dense<0.000000e+00> : vector<128xf32>
      %29 = vector.multi_reduction <add>, %28, %cst_24 [1] : vector<128x128xf32> to vector<128xf32>
      %30 = vector.shape_cast %29 : vector<128xf32> to vector<128x1xf32>
      %31 = math.log %30 : vector<128x1xf32>
      %32 = arith.addf %25, %31 : vector<128x1xf32>
      %33 = tpu.iota {dimensions = array<i32: 1>} : vector<128x128xi32>
      %c0_25 = arith.constant 0 : index
      %c0_26 = arith.constant 0 : index
      %34 = vector.load %arg7[%c0_25, %c0_26] : memref<128x1xi32, #tpu.memory_space<vmem>>, vector<128x1xi32>
      %35 = vector.broadcast %34 : vector<128x1xi32> to vector<128x128xi32>
      %36 = arith.cmpi eq, %33, %35 : vector<128x128xi32>
      %37 = arith.extui %36 : vector<128x128xi1> to vector<128x128xi32>
      %38 = arith.sitofp %37 : vector<128x128xi32> to vector<128x128xf32>
      %39 = arith.mulf %22, %38 : vector<128x128xf32>
      %cst_27 = arith.constant dense<0.000000e+00> : vector<128xf32>
      %40 = vector.multi_reduction <add>, %39, %cst_27 [1] : vector<128x128xf32> to vector<128xf32>
      %41 = vector.shape_cast %40 : vector<128xf32> to vector<128x1xf32>
      %42 = arith.subf %32, %41 : vector<128x1xf32>
      %c0_28 = arith.constant 0 : index
      %c0_29 = arith.constant 0 : index
      %43 = vector.load %arg10[%c0_28, %c0_29] : memref<128x1xf32, #tpu.memory_space<vmem>>, vector<128x1xf32>
      tpu.vector_store %arg10[%c0_28, %c0_29], %42 {strides = array<i32>} : memref<128x1xf32, #tpu.memory_space<vmem>>, vector<128x1xf32>,
    } else {
    }
    return
  }
  func.func @transform_0(%arg0: i32, %arg1: i32) -> (i32, i32) {
    %c0_i32 = arith.constant 0 : i32
    return %arg0, %arg1 : i32, i32
  }
  func.func @transform_1(%arg0: i32, %arg1: i32) -> (i32, i32) {
    %c0_i32 = arith.constant 0 : i32
    %c0_i32_0 = arith.constant 0 : i32
    return %arg1, %c0_i32 : i32, i32
  }
  func.func @transform_2(%arg0: i32, %arg1: i32) -> (i32, i32) {
    %c0_i32 = arith.constant 0 : i32
    %c0_i32_0 = arith.constant 0 : i32
    %c0_i32_1 = arith.constant 0 : i32
    return %c0_i32, %c0_i32_0 : i32, i32
  }
  func.func @transform_3(%arg0: i32, %arg1: i32) -> (i32, i32) {
    %c0_i32 = arith.constant 0 : i32
    %c0_i32_0 = arith.constant 0 : i32
    %c0_i32_1 = arith.constant 0 : i32
    return %c0_i32, %c0_i32_0 : i32, i32
  }
  func.func @transform_4(%arg0: i32, %arg1: i32) -> (i32, i32) {
    %c0_i32 = arith.constant 0 : i32
    %c0_i32_0 = arith.constant 0 : i32
    %c0_i32_1 = arith.constant 0 : i32
    return %c0_i32, %c0_i32_0 : i32, i32
  }
  func.func @transform_5(%arg0: i32, %arg1: i32) -> (i32, i32) {
    %c0_i32 = arith.constant 0 : i32
    %c0_i32_0 = arith.constant 0 : i32
    return %arg0, %c0_i32 : i32, i32
  }
  func.func @transform_6(%arg0: i32, %arg1: i32) -> (i32, i32) {
    %c0_i32 = arith.constant 0 : i32
    %c0_i32_0 = arith.constant 0 : i32
    return %arg0, %c0_i32 : i32, i32
  }
  func.func @transform_7(%arg0: i32, %arg1: i32) -> (i32, i32) {
    %c0_i32 = arith.constant 0 : i32
    %c0_i32_0 = arith.constant 0 : i32
    return %arg0, %c0_i32 : i32, i32
  }
  func.func @transform_8(%arg0: i32, %arg1: i32) -> (i32, i32) {
    %c0_i32 = arith.constant 0 : i32
    %c0_i32_0 = arith.constant 0 : i32
    return %arg0, %c0_i32 : i32, i32
  }
}

</mosaic_0001>

<bundles_post_ra>
// kernel: tpu_custom_call.1
= control target key start
LH: loop header
LB: loop body
LE: loop exit
PB: predicated region body
PF: predicated region fallthrough
CT: control target
= control target key end

     0   :  { %14 = vsyncpa [#allocation4], 0  ;;  %s1711_s0 = inlined_call_operand.vmem [shape: bf16[128,128], index: 0, kind: input, shape index: {}]   ;;  %s1712_s1 = inlined_call_operand.vmem [shape: bf16[128,128], index: 1, kind: input, shape index: {}]   ;;  %s1713_s2 = inlined_call_operand.vmem [shape: f32[1,128], index: 2, kind: input, shape index: {}]   ;;  %s1714_s3 = inlined_call_operand.hbm [shape: bf16[128,128], index: 3, kind: input, shape index: {}]   ;;  %s1715_s4 = inlined_call_operand.vmem [shape: f32[1,128], index: 4, kind: input, shape index: {}]   ;;  %s1716_s5 = inlined_call_operand.vmem [shape: s32[128,1], index: 5, kind: input, shape index: {}]   ;;  %s1717_s6 = inlined_call_operand.hbm [shape: f32[128,128], index: 6, kind: output, shape index: {0}]   ;;  %s1718_s7 = inlined_call_operand.hbm [shape: f32[128,128], index: 7, kind: output, shape index: {1}]   ;;  %s1719_s8 = inlined_call_operand.vmem [shape: f32[128,1], index: 8, kind: output, shape index: {2}]  }
   0x1   :  { %15 = vsyncpa [#allocation5], 0 }
   0x2   :  { %16 = vsyncpa [#allocation8], 0  ;;  %s27_s29 = sshll.u32 %s1714_s3, 4  ;;  %s1189_s30 = smov [#allocation3]   ;;  %s28_s29 = int_to_ptr.hbm [resolvable:$true] %s27_s29 }
   0x3   :  { %s29_s9 = sshll.u32 %s1189_s30, 4  ;;  %s1190_s10 = smov 64   ;;  %s30_s9 = int_to_ptr.vmem [resolvable:$true] %s29_s9 }
   0x4   :  { %s1191_s11 = smov 4  }
   0x5   :  { %35 = dma.hbm_to_vmem [thread:$0]  %s28_s29, 1024, %s30_s9, [#allocation4], %s1190_s10, %s1190_s10, %s1191_s11  }
   0x6   :  { %1183 = dma.done.wait [#allocation4], 1024  }
   0x7   :  { %1184 = vsyncadd [#allocation4], 4294966272  ;;  %v1008_v0 = vld [vmem:[%s1712_s1 + $0x38] sm:$0xff]  ;;  %v1007_v1 = vld [vmem:[%s1712_s1 + $0x30] sm:$0xff]  ;;  %v1192_v24 = vmov 0   ;;  %s846_s30 = sshll.u32 %s1717_s6, 4  ;;  %s847_s30 = int_to_ptr.hbm [resolvable:$true] %s846_s30 }
   0x8   :  { %208 = vmatpush.bf16.msra.mxu0 %v1008_v0  ;;  %1017 = vmatpush.bf16.msra.mxu2 %v1008_v0  ;;  %v1006_v2 = vld [vmem:[%s1712_s1 + $0x28] sm:$0xff]  ;;  %v1005_v3 = vld [vmem:[%s1712_s1 + $0x20] sm:$0xff]  ;;  %v1004_v4 = vld [vmem:[%s1712_s1 + $0x18] sm:$0xff]  ;;  %s1195_s9 = smov 128   ;;  %s1196_s10 = smov 8  }
   0x9   :  { %v1003_v5 = vld [vmem:[%s1712_s1 + $0x10] sm:$0xff]  ;;  %v1002_v6 = vld [vmem:[%s1712_s1 + $0x8] sm:$0xff]  ;;  %v1001_v7 = vld [vmem:[%s1712_s1] sm:$0xff]  ;;  %1042 = vset.pattern.permute.xlu2 %v1192_v24  ;;  %1044 = vset.pattern.permute.xlu1 %v1192_v24  ;;  %s1197_s11 = smov [#allocation7]   ;;  %s859_s14 = sshll.u32 %s1718_s7, 4  ;;  %s860_s14 = int_to_ptr.hbm [resolvable:$true] %s859_s14 }
   0xa   :  { %v993_v8 = vld [vmem:[%s1711_s0] sm:$0xff]  ;;  %v994_v10 = vld [vmem:[%s1711_s0 + $0x8] sm:$0xff]  ;;  %v1016_v12 = vld [vmem:[#allocation3 + $0x38] sm:$0xff]  ;;  %1043 = vset.pattern.permute.xlu0 %v1192_v24  ;;  %s857_s12 = sshll.u32 %s1197_s11, 4  ;;  %s858_s12 = int_to_ptr.vmem [resolvable:$true] %s857_s12 }
   0xb   :  { %v997_v9 = vld [vmem:[%s1711_s0 + $0x20] sm:$0xff]  ;;  %v998_v11 = vld [vmem:[%s1711_s0 + $0x28] sm:$0xff]  ;;  %420 = vmatpush.bf16.msra.mxu1 %v1016_v12  ;;  %v1015_v13 = vld [vmem:[#allocation3 + $0x30] sm:$0xff]  ;;  %1025 = vmatpush.bf16.msra.mxu3 %v1016_v12 }
   0xc   :  { %209 = vmatpush.bf16.msra.mxu0 %v1007_v1  ;;  %1018 = vmatpush.bf16.msra.mxu2 %v1007_v1  ;;  %v1014_v14 = vld [vmem:[#allocation3 + $0x28] sm:$0xff]  ;;  %v1013_v15 = vld [vmem:[#allocation3 + $0x20] sm:$0xff]  ;;  %v995_v16 = vld [vmem:[%s1711_s0 + $0x10] sm:$0xff] }
   0xd   :  { %v999_v17 = vld [vmem:[%s1711_s0 + $0x30] sm:$0xff]  ;;  %v1012_v18 = vld [vmem:[#allocation3 + $0x18] sm:$0xff]  ;;  %v1010_v22 = vld [vmem:[#allocation3 + $0x8] sm:$0xff] }
   0xe   :  { %v996_v19 = vld [vmem:[%s1711_s0 + $0x18] sm:$0xff]  ;;  %v1011_v21 = vld [vmem:[#allocation3 + $0x10] sm:$0xff]  ;;  %v1009_v23 = vld [vmem:[#allocation3] sm:$0xff] }
   0xf   :  { %421 = vmatpush.bf16.msra.mxu1 %v1015_v13  ;;  %1026 = vmatpush.bf16.msra.mxu3 %v1015_v13  ;;  %v1000_v20 = vld [vmem:[%s1711_s0 + $0x38] sm:$0xff]  ;;  %v647_v25 = vld [vmem:[%s1716_s5] sm:$0xff]  ;;  %v649_v26 = vld [vmem:[%s1716_s5 + $0x10] sm:$0xff] }
  0x10   :  { %210 = vmatpush.bf16.msra.mxu0 %v1006_v2  ;;  %1019 = vmatpush.bf16.msra.mxu2 %v1006_v2  ;;  %v650_v27 = vld [vmem:[%s1716_s5 + $0x18] sm:$0xff]  ;;  %v652_v28 = vld [vmem:[%s1716_s5 + $0x28] sm:$0xff]  ;;  %v651_v30 = vld [vmem:[%s1716_s5 + $0x20] sm:$0xff] }
  0x11   :  { %664 = vperm.xlu2 %1042, %v647_v25   ;;  %670 = vperm.xlu1 %1044, %v649_v26   ;;  %v648_v29 = vld [vmem:[%s1716_s5 + $0x8] sm:$0xff]  ;;  %v1315_v31 = vld [vmem:[%s1713_s2] ss:$0 sm:$0xff]  ;;  %v654_v34 = vld [vmem:[%s1716_s5 + $0x38] sm:$0xff]  ;;  %v1193_v26 = vmov 0.0  }
  0x12   :  { %667 = vperm.xlu0 %1043, %v648_v29   ;;  %v655_v35 = vld [vmem:[%s1716_s5 + $0x40] sm:$0xff]  ;;  %v653_v36 = vld [vmem:[%s1716_s5 + $0x30] sm:$0xff]  ;;  %v658_v42 = vld [vmem:[%s1716_s5 + $0x58] sm:$0xff] }
  0x13   :  { %422 = vmatpush.bf16.msra.mxu1 %v1014_v14  ;;  %1027 = vmatpush.bf16.msra.mxu3 %v1014_v14  ;;  %v657_v41 = vld [vmem:[%s1716_s5 + $0x50] sm:$0xff]  ;;  %v656_v43 = vld [vmem:[%s1716_s5 + $0x48] sm:$0xff]  ;;  %v659_v52 = vld [vmem:[%s1716_s5 + $0x60] sm:$0xff] }
  0x14   :  { %211 = vmatpush.bf16.msra.mxu0 %v1005_v3  ;;  %1020 = vmatpush.bf16.msra.mxu2 %v1005_v3  ;;  %v660_v50 = vld [vmem:[%s1716_s5 + $0x68] sm:$0xff]  ;;  %v661_v51 = vld [vmem:[%s1716_s5 + $0x70] sm:$0xff]  ;;  %v662_v57 = vld [vmem:[%s1716_s5 + $0x78] sm:$0xff] }
  0x17   :  { %423 = vmatpush.bf16.msra.mxu1 %v1013_v15  ;;  %1028 = vmatpush.bf16.msra.mxu3 %v1013_v15 }
  0x18   :  { %212 = vmatpush.bf16.msra.mxu0 %v1004_v4  ;;  %1021 = vmatpush.bf16.msra.mxu2 %v1004_v4 }
  0x19   :  { %673 = vperm.xlu2 %1042, %v650_v27   ;;  %679 = vperm.xlu1 %1044, %v652_v28  }
  0x1a   :  { %688 = vperm.xlu0 %1043, %v655_v35  }
  0x1b   :  { %424 = vmatpush.bf16.msra.mxu1 %v1012_v18  ;;  %1029 = vmatpush.bf16.msra.mxu3 %v1012_v18 }
  0x1c   :  { %213 = vmatpush.bf16.msra.mxu0 %v1003_v5  ;;  %1022 = vmatpush.bf16.msra.mxu2 %v1003_v5 }
  0x1f   :  { %425 = vmatpush.bf16.msra.mxu1 %v1011_v21  ;;  %1030 = vmatpush.bf16.msra.mxu3 %v1011_v21 }
  0x20   :  { %214 = vmatpush.bf16.msra.mxu0 %v1002_v6  ;;  %1023 = vmatpush.bf16.msra.mxu2 %v1002_v6 }
  0x21   :  { %676 = vperm.xlu2 %1042, %v651_v30   ;;  %685 = vperm.xlu1 %1044, %v654_v34  }
  0x22   :  { %697 = vperm.xlu0 %1043, %v658_v42  }
  0x23   :  { %426 = vmatpush.bf16.msra.mxu1 %v1010_v22  ;;  %1031 = vmatpush.bf16.msra.mxu3 %v1010_v22  ;;  %v645_v22 = vlaneseq }
  0x24   :  { %215 = vmatpush.bf16.msra.mxu0 %v1001_v7  ;;  %1024 = vmatpush.bf16.msra.mxu2 %v1001_v7 }
  0x27   :  { %216 = vmatmul.bf16.vlgmr.msra.gmra.mxu0 %v993_v8  ;;  %236 = vmatmul.bf16.vlgmr.msra.gmra.mxu2 %v997_v9 }
  0x28   :  { %427 = vmatpush.bf16.msra.mxu1 %v1009_v23  ;;  %1032 = vmatpush.bf16.msra.mxu3 %v1009_v23  ;;  %v1369_v23 = vand.u32 127, %v645_v22 }
  0x29   :  { %682 = vperm.xlu2 %1042, %v653_v36   ;;  %694 = vperm.xlu1 %1044, %v657_v41  }
  0x2a   :  { %706 = vperm.xlu0 %1043, %v661_v51  }
  0x31   :  { %691 = vperm.xlu2 %1042, %v656_v43   ;;  %703 = vperm.xlu1 %1044, %v660_v50  }
  0x37   :  { %221 = vmatmul.bf16.gmra.mxu0 %v994_v10  ;;  %241 = vmatmul.bf16.gmra.mxu2 %v998_v11 }
  0x39   :  { %700 = vperm.xlu2 %1042, %v659_v52  }
  0x41   :  { %709 = vperm.xlu2 %1042, %v662_v57  }
  0x47   :  { %226 = vmatmul.bf16.gmra.mxu0 %v995_v16  ;;  %246 = vmatmul.bf16.gmra.mxu2 %v999_v17 }
  0x57   :  { %231 = vmatmul.bf16.gmra.mxu0 %v996_v19  ;;  %251 = vmatmul.bf16.gmra.mxu2 %v1000_v20 }
  0x6b   :  { %v665_v18 = vpop.permute.xlu2 %664 }
  0x6c   :  { %vm711_vm9 = vcmp.eq.s32.totalorder %v1369_v23, %v665_v18 }
  0x73   :  { %v1363_v19 = vpop.permute.xlu2 %673 }
  0x74   :  { %vm714_vm12 = vcmp.eq.s32.totalorder %v1369_v23, %v1363_v19 }
  0x7b   :  { %v1365_v20 = vpop.permute.xlu2 %676 }
  0x7c   :  { %vm715_vm13 = vcmp.eq.s32.totalorder %v1369_v23, %v1365_v20 }
  0x83   :  { %v1367_v21 = vpop.permute.xlu2 %682  ;;  %v671_v24 = vpop.permute.xlu1 %670 }
  0x84   :  { %v668_v29 = vpop.permute.xlu0 %667  ;;  %vm713_vm11 = vcmp.eq.s32.totalorder %v1369_v23, %v671_v24  ;;  %vm717_vm15 = vcmp.eq.s32.totalorder %v1369_v23, %v1367_v21 }
  0x85   :  { %vm712_vm10 = vcmp.eq.s32.totalorder %v1369_v23, %v668_v29  ;;  %v983_v19 = vsel %vm717_vm15, 1.0, %v1193_v26 }
  0x8b   :  { %v692_v25 = vpop.permute.xlu2 %691  ;;  %v1375_v28 = vpop.permute.xlu1 %679 }
  0x8c   :  { %vm720_vm0 = vcmp.eq.s32.totalorder %v1369_v23, %v692_v25  ;;  %vm716_vm14 = vcmp.eq.s32.totalorder %v1369_v23, %v1375_v28 }
  0x8d   :  { %v1373_v27 = vsel %vm720_vm0, 1.0, %v1193_v26  ;;  %vm823_vm0 = vcmask 7168  }
  0x93   :  { %v701_v30 = vpop.permute.xlu2 %700 }
  0x94   :  { %vm723_vm1 = vcmp.eq.s32.totalorder %v1369_v23, %v701_v30 }
  0x9b   :  { %v710_v34 = vpop.permute.xlu2 %709 }
  0x9c   :  { %vm726_vm4 = vcmp.eq.s32.totalorder %v1369_v23, %v710_v34 }
  0xa4   :  { %v217_v32 = vpop.f32.mrf.mxu0 }
  0xa5   :  { %v312_v33 = vadd.f32 %v1315_v31, %v217_v32  ;;  %v686_v32 = vpop.permute.xlu1 %685 }
  0xa6   :  { %vm718_vm2 = vcmp.eq.s32.totalorder %v1369_v23, %v686_v32 }
  0xa7   :  { %328 = vst [vmem:[#allocation7] sm:$0xff] %v312_v33  ;;  %v1384_v35 = vsel %vm718_vm2, 1.0, %v1193_v26 }
  0xaa   :  { %v237_v37 = vpop.f32.mrf.mxu2 }
  0xab   :  { %v320_v38 = vadd.f32 %v1315_v31, %v237_v37  ;;  %v1391_v37 = vsel %vm726_vm4, 1.0, %v1193_v26 }
  0xac   :  { %v219_v39 = vpop.f32.mrf.mxu0 }
  0xad   :  { %336 = vst [vmem:[#allocation7 + $0x40] sm:$0xff] %v320_v38  ;;  %v313_v40 = vadd.f32 %v1315_v31, %v219_v39 }
  0xaf   :  { %329 = vst [vmem:[#allocation7 + $0x8] sm:$0xff] %v313_v40  ;;  %v344_v44 = vpack.c.bf16 %v313_v40, %v312_v33  ;;  %v689_v33 = vpop.permute.xlu0 %688 }
  0xb0   :  { %vm719_vm3 = vcmp.eq.s32.totalorder %v1369_v23, %v689_v33 }
  0xb1   :  { %428 = vmatmul.bf16.vlgmr.msra.gmra.mxu1 %v344_v44  ;;  %v1387_v36 = vsel %vm719_vm3, 1.0, %v1193_v26 }
  0xb2   :  { %v239_v45 = vpop.f32.mrf.mxu2 }
  0xb3   :  { %v321_v46 = vadd.f32 %v1315_v31, %v239_v45 }
  0xb4   :  { %v222_v47 = vpop.f32.mrf.mxu0 }
  0xb5   :  { %337 = vst [vmem:[#allocation7 + $0x48] sm:$0xff] %v321_v46  ;;  %v314_v48 = vadd.f32 %v1315_v31, %v222_v47  ;;  %v348_v49 = vpack.c.bf16 %v321_v46, %v320_v38  ;;  %v695_v38 = vpop.permute.xlu1 %694  ;;  %v1413_v46 = vld [vmem:[%s1715_s4] ss:$0 sm:$0xff]  ;;  %v977_v47 = vsel %vm711_vm9, 1.0, %v1193_v26  ;;  %s1194_s4 = smov [#allocation6]  }
  0xb6   :  { %vm721_vm5 = vcmp.eq.s32.totalorder %v1369_v23, %v695_v38  ;;  %s844_s27 = sshll.u32 %s1194_s4, 4  ;;  %s845_s27 = int_to_ptr.vmem [resolvable:$true] %s844_s27 }
  0xb7   :  { %330 = vst [vmem:[#allocation7 + $0x10] sm:$0xff] %v314_v48  ;;  %448 = vmatmul.bf16.vlgmr.msra.gmra.mxu3 %v348_v49  ;;  %v698_v39 = vpop.permute.xlu0 %697  ;;  %v1396_v40 = vsel %vm721_vm5, 1.0, %v1193_v26 }
  0xb8   :  { %vm722_vm6 = vcmp.eq.s32.totalorder %v1369_v23, %v698_v39 }
  0xb9   :  { %v1399_v41 = vsel %vm722_vm6, 1.0, %v1193_v26 }
  0xba   :  { %v242_v53 = vpop.f32.mrf.mxu2 }
  0xbb   :  { %v322_v54 = vadd.f32 %v1315_v31, %v242_v53 }
  0xbc   :  { %v224_v55 = vpop.f32.mrf.mxu0 }
  0xbd   :  { %338 = vst [vmem:[#allocation7 + $0x50] sm:$0xff] %v322_v54  ;;  %v315_v56 = vadd.f32 %v1315_v31, %v224_v55  ;;  %v704_v42 = vpop.permute.xlu1 %703  ;;  %v978_v55 = vsel %vm712_vm10, 1.0, %v1193_v26 }
  0xbe   :  { %vm724_vm7 = vcmp.eq.s32.totalorder %v1369_v23, %v704_v42 }
  0xbf   :  { %331 = vst [vmem:[#allocation7 + $0x18] sm:$0xff] %v315_v56  ;;  %v345_v58 = vpack.c.bf16 %v315_v56, %v314_v48  ;;  %v707_v43 = vpop.permute.xlu0 %706  ;;  %v1404_v44 = vsel %vm724_vm7, 1.0, %v1193_v26 }
  0xc0   :  { %vm725_vm8 = vcmp.eq.s32.totalorder %v1369_v23, %v707_v43 }
  0xc1   :  { %433 = vmatmul.bf16.gmra.mxu1 %v345_v58  ;;  %v1407_v45 = vsel %vm725_vm8, 1.0, %v1193_v26 }
  0xc2   :  { %v244_v59 = vpop.f32.mrf.mxu2 }
  0xc3   :  { %v323_v60 = vadd.f32 %v1315_v31, %v244_v59  ;;  %v979_v59 = vsel %vm713_vm11, 1.0, %v1193_v26 }
  0xc4   :  { %v227_v61 = vpop.f32.mrf.mxu0 }
  0xc5   :  { %339 = vst [vmem:[#allocation7 + $0x58] sm:$0xff] %v323_v60  ;;  %v316_v62 = vadd.f32 %v1315_v31, %v227_v61  ;;  %v349_v63 = vpack.c.bf16 %v323_v60, %v322_v54 }
  0xc7   :  { %332 = vst [vmem:[#allocation7 + $0x20] sm:$0xff] %v316_v62  ;;  %453 = vmatmul.bf16.gmra.mxu3 %v349_v63 }
  0xca   :  { %v247_v0 = vpop.f32.mrf.mxu2 }
  0xcb   :  { %v324_v1 = vadd.f32 %v1315_v31, %v247_v0 }
  0xcc   :  { %v229_v2 = vpop.f32.mrf.mxu0 }
  0xcd   :  { %340 = vst [vmem:[#allocation7 + $0x60] sm:$0xff] %v324_v1  ;;  %v317_v3 = vadd.f32 %v1315_v31, %v229_v2 }
  0xcf   :  { %333 = vst [vmem:[#allocation7 + $0x28] sm:$0xff] %v317_v3  ;;  %v346_v4 = vpack.c.bf16 %v317_v3, %v316_v62  ;;  %v980_v3 = vsel %vm714_vm12, 1.0, %v1193_v26 }
  0xd1   :  { %438 = vmatmul.bf16.gmra.mxu1 %v346_v4 }
  0xd2   :  { %v249_v5 = vpop.f32.mrf.mxu2 }
  0xd3   :  { %v325_v6 = vadd.f32 %v1315_v31, %v249_v5 }
  0xd4   :  { %v232_v7 = vpop.f32.mrf.mxu0 }
  0xd5   :  { %341 = vst [vmem:[#allocation7 + $0x68] sm:$0xff] %v325_v6  ;;  %v318_v8 = vadd.f32 %v1315_v31, %v232_v7  ;;  %v350_v9 = vpack.c.bf16 %v325_v6, %v324_v1 }
  0xd7   :  { %334 = vst [vmem:[#allocation7 + $0x30] sm:$0xff] %v318_v8  ;;  %458 = vmatmul.bf16.gmra.mxu3 %v350_v9  ;;  %v981_v9 = vsel %vm715_vm13, 1.0, %v1193_v26 }
  0xda   :  { %v252_v10 = vpop.f32.mrf.mxu2 }
  0xdb   :  { %v326_v11 = vadd.f32 %v1315_v31, %v252_v10 }
  0xdc   :  { %v234_v12 = vpop.f32.mrf.mxu0 }
  0xdd   :  { %342 = vst [vmem:[#allocation7 + $0x70] sm:$0xff] %v326_v11  ;;  %v319_v13 = vadd.f32 %v1315_v31, %v234_v12 }
  0xdf   :  { %335 = vst [vmem:[#allocation7 + $0x38] sm:$0xff] %v319_v13  ;;  %v347_v14 = vpack.c.bf16 %v319_v13, %v318_v8  ;;  %v982_v13 = vsel %vm716_vm14, 1.0, %v1193_v26 }
  0xe1   :  { %443 = vmatmul.bf16.gmra.mxu1 %v347_v14 }
  0xe2   :  { %v254_v15 = vpop.f32.mrf.mxu2 }
  0xe3   :  { %v327_v16 = vadd.f32 %v1315_v31, %v254_v15  ;;  %v1379_v31 = vsel %vm723_vm1, 1.0, %v1193_v26 }
  0xe5   :  { %343 = vst [vmem:[#allocation7 + $0x78] sm:$0xff] %v327_v16  ;;  %v351_v17 = vpack.c.bf16 %v327_v16, %v326_v11 }
  0xe6   :  { %865 = dma.vmem_to_hbm [thread:$0]  %s858_s12, 2048, %s860_s14, [#allocation8], %s1195_s9, %s1195_s9, %s1196_s10  }
  0xe7   :  { %463 = vmatmul.bf16.gmra.mxu3 %v351_v17 }
 0x12e   :  { %v429_v48 = vpop.f32.mrf.mxu1 }
 0x12f   :  { %v1417_v49 = vadd.f32 %v1413_v46, %v429_v48 }
 0x131   :  { %469 = vst [vmem:[#allocation6] sm:$0xff] %v1417_v49  ;;  %485 = vmax.xlane.f32.xlu0 %v1417_v49  ;;  %v759_v50 = vmul.f32 %v977_v47, %v1417_v49 }
 0x133   :  { %775 = vadd.xlane.f32.xlu1 %v759_v50 }
 0x136   :  { %v431_v51 = vpop.f32.mrf.mxu1 }
 0x137   :  { %v1423_v52 = vadd.f32 %v1413_v46, %v431_v51 }
 0x139   :  { %470 = vst [vmem:[#allocation6 + $0x8] sm:$0xff] %v1423_v52  ;;  %487 = vmax.xlane.f32.xlu0 %v1423_v52  ;;  %v760_v58 = vmul.f32 %v978_v55, %v1423_v52 }
 0x13a   :  { %v449_v53 = vpop.f32.mrf.mxu3 }
 0x13b   :  { %v1429_v54 = vadd.f32 %v1413_v46, %v449_v53 }
 0x13d   :  { %477 = vst [vmem:[#allocation6 + $0x40] sm:$0xff] %v1429_v54  ;;  %501 = vmax.xlane.f32.xlu2 %v1429_v54  ;;  %v767_v33 = vmul.f32 %v1387_v36, %v1429_v54 }
 0x13e   :  { %v434_v56 = vpop.f32.mrf.mxu1 }
 0x13f   :  { %v1436_v57 = vadd.f32 %v1413_v46, %v434_v56 }
 0x141   :  { %471 = vst [vmem:[#allocation6 + $0x10] sm:$0xff] %v1436_v57  ;;  %777 = vadd.xlane.f32.xlu0 %v760_v58  ;;  %489 = vmax.xlane.f32.xlu1 %v1436_v57  ;;  %v761_v62 = vmul.f32 %v979_v59, %v1436_v57 }
 0x142   :  { %v451_v60 = vpop.f32.mrf.mxu3 }
 0x143   :  { %v1443_v61 = vadd.f32 %v1413_v46, %v451_v60 }
 0x145   :  { %478 = vst [vmem:[#allocation6 + $0x48] sm:$0xff] %v1443_v61  ;;  %779 = vadd.xlane.f32.xlu2 %v761_v62  ;;  %v768_v32 = vmul.f32 %v1373_v27, %v1443_v61 }
 0x146   :  { %v436_v63 = vpop.f32.mrf.mxu1 }
 0x147   :  { %v1448_v0 = vadd.f32 %v1413_v46, %v436_v63 }
 0x149   :  { %472 = vst [vmem:[#allocation6 + $0x18] sm:$0xff] %v1448_v0  ;;  %503 = vmax.xlane.f32.xlu0 %v1443_v61  ;;  %491 = vmax.xlane.f32.xlu1 %v1448_v0  ;;  %v762_v6 = vmul.f32 %v980_v3, %v1448_v0 }
 0x14a   :  { %v454_v1 = vpop.f32.mrf.mxu3 }
 0x14b   :  { %v1456_v2 = vadd.f32 %v1413_v46, %v454_v1 }
 0x14d   :  { %479 = vst [vmem:[#allocation6 + $0x50] sm:$0xff] %v1456_v2 }
 0x14e   :  { %v439_v4 = vpop.f32.mrf.mxu1 }
 0x14f   :  { %v1461_v5 = vadd.f32 %v1413_v46, %v439_v4 }
 0x151   :  { %473 = vst [vmem:[#allocation6 + $0x20] sm:$0xff] %v1461_v5  ;;  %781 = vadd.xlane.f32.xlu1 %v762_v6  ;;  %493 = vmax.xlane.f32.xlu2 %v1461_v5  ;;  %v763_v12 = vmul.f32 %v981_v9, %v1461_v5 }
 0x152   :  { %v456_v7 = vpop.f32.mrf.mxu3 }
 0x153   :  { %v1469_v8 = vadd.f32 %v1413_v46, %v456_v7 }
 0x155   :  { %480 = vst [vmem:[#allocation6 + $0x58] sm:$0xff] %v1469_v8 }
 0x156   :  { %v441_v10 = vpop.f32.mrf.mxu1 }
 0x157   :  { %v1476_v11 = vadd.f32 %v1413_v46, %v441_v10 }
 0x159   :  { %474 = vst [vmem:[#allocation6 + $0x28] sm:$0xff] %v1476_v11  ;;  %505 = vmax.xlane.f32.xlu1 %v1456_v2  ;;  %783 = vadd.xlane.f32.xlu2 %v763_v12  ;;  %v764_v14 = vmul.f32 %v982_v13, %v1476_v11 }
 0x15a   :  { %v459_v15 = vpop.f32.mrf.mxu3 }
 0x15b   :  { %v1484_v16 = vadd.f32 %v1413_v46, %v459_v15  ;;  %785 = vadd.xlane.f32.xlu0 %v764_v14 }
 0x15d   :  { %481 = vst [vmem:[#allocation6 + $0x60] sm:$0xff] %v1484_v16 }
 0x15e   :  { %v444_v17 = vpop.f32.mrf.mxu1 }
 0x15f   :  { %v1490_v18 = vadd.f32 %v1413_v46, %v444_v17 }
 0x161   :  { %475 = vst [vmem:[#allocation6 + $0x30] sm:$0xff] %v1490_v18  ;;  %507 = vmax.xlane.f32.xlu2 %v1469_v8  ;;  %v765_v20 = vmul.f32 %v983_v19, %v1490_v18 }
 0x162   :  { %v461_v22 = vpop.f32.mrf.mxu3 }
 0x163   :  { %v1497_v24 = vadd.f32 %v1413_v46, %v461_v22  ;;  %509 = vmax.xlane.f32.xlu0 %v1484_v16  ;;  %787 = vadd.xlane.f32.xlu1 %v765_v20 }
 0x165   :  { %482 = vst [vmem:[#allocation6 + $0x68] sm:$0xff] %v1497_v24 }
 0x166   :  { %v446_v21 = vpop.f32.mrf.mxu1 }
 0x167   :  { %v1502_v23 = vadd.f32 %v1413_v46, %v446_v21 }
 0x169   :  { %476 = vst [vmem:[#allocation6 + $0x38] sm:$0xff] %v1502_v23  ;;  %495 = vmax.xlane.f32.xlu2 %v1476_v11  ;;  %v766_v30 = vmul.f32 %v1384_v35, %v1502_v23 }
 0x16a   :  { %v464_v25 = vpop.f32.mrf.mxu3 }
 0x16b   :  { %v1507_v26 = vadd.f32 %v1413_v46, %v464_v25  ;;  %497 = vmax.xlane.f32.xlu0 %v1490_v18  ;;  %511 = vmax.xlane.f32.xlu1 %v1497_v24 }
 0x16d   :  { %483 = vst [vmem:[#allocation6 + $0x70] sm:$0xff] %v1507_v26 }
 0x171   :  { %513 = vmax.xlane.f32.xlu2 %v1507_v26 }
 0x172   :  { %v466_v28 = vpop.f32.mrf.mxu3 }
 0x173   :  { %v1514_v29 = vadd.f32 %v1413_v46, %v466_v28  ;;  %499 = vmax.xlane.f32.xlu1 %v1502_v23 }
 0x175   :  { %484 = vst [vmem:[#allocation6 + $0x78] sm:$0xff] %v1514_v29  ;;  %515 = vmax.xlane.f32.xlu0 %v1514_v29 }
 0x176   :  { %852 = dma.vmem_to_hbm [thread:$0]  %s845_s27, 2048, %s847_s30, [#allocation5], %s1195_s9, %s1195_s9, %s1196_s10  }
 0x179   :  { %789 = vadd.xlane.f32.xlu2 %v766_v30 }
 0x17b   :  { %793 = vadd.xlane.f32.xlu1 %v768_v32 }
 0x17d   :  { %791 = vadd.xlane.f32.xlu0 %v767_v33 }
 0x1a4   :  { %v1525_v34 = vpop.xlane.xlu0 %485 }
 0x1a5   :  { %v517_v38 = vsub.f32 %v1417_v49, %v1525_v34 }
 0x1a6   :  { %v1529_v42 = vpop.xlane.xlu1 %775 }
 0x1a7   :  { %v533_v39 = vmul.f32 1.442695, %v517_v38 }
 0x1a9   :  { %1047 = vpow2.f32 %v533_v39 }
 0x1ac   :  { %v1531_v43 = vpop.xlane.xlu0 %487 }
 0x1ad   :  { %v518_v35 = vsub.f32 %v1423_v52, %v1531_v43 }
 0x1af   :  { %v1048_v27 = vpop.eup %1047  ;;  %v535_v46 = vmul.f32 1.442695, %v518_v35 }
 0x1b0   :  { %v1535_v47 = vpop.xlane.xlu2 %501  ;;  %565 = vadd.xlane.f32.xlu1 %v1048_v27 }
 0x1b1   :  { %1049 = vpow2.f32 %v535_v46  ;;  %v525_v36 = vsub.f32 %v1429_v54, %v1535_v47 }
 0x1b3   :  { %v549_v48 = vmul.f32 1.442695, %v525_v36 }
 0x1b4   :  { %v1539_v49 = vpop.xlane.xlu0 %777  ;;  %v1541_v50 = vpop.xlane.xlu1 %489 }
 0x1b5   :  { %1051 = vpow2.f32 %v549_v48  ;;  %v519_v51 = vsub.f32 %v1436_v57, %v1541_v50 }
 0x1b7   :  { %v1050_v53 = vpop.eup %1049  ;;  %v537_v52 = vmul.f32 1.442695, %v519_v51 }
 0x1b8   :  { %567 = vadd.xlane.f32.xlu2 %v1050_v53  ;;  %v1545_v56 = vpop.xlane.xlu2 %779 }
 0x1b9   :  { %1053 = vpow2.f32 %v537_v52 }
 0x1bb   :  { %v1052_v55 = vpop.eup %1051 }
 0x1bc   :  { %v1547_v58 = vpop.xlane.xlu0 %503  ;;  %v1549_v59 = vpop.xlane.xlu1 %491  ;;  %581 = vadd.xlane.f32.xlu0 %v1052_v55 }
 0x1bd   :  { %v526_v54 = vsub.f32 %v1443_v61, %v1547_v58  ;;  %v520_v57 = vsub.f32 %v1448_v0, %v1549_v59 }
 0x1bf   :  { %v551_v60 = vmul.f32 1.442695, %v526_v54  ;;  %v1054_v62 = vpop.eup %1053  ;;  %v539_v3 = vmul.f32 1.442695, %v520_v57 }
 0x1c1   :  { %1055 = vpow2.f32 %v551_v60 }
 0x1c2   :  { %1057 = vpow2.f32 %v539_v3 }
 0x1c4   :  { %v1555_v63 = vpop.xlane.xlu1 %781  ;;  %v1557_v1 = vpop.xlane.xlu2 %493  ;;  %569 = vadd.xlane.f32.xlu0 %v1054_v62 }
 0x1c5   :  { %v521_v12 = vsub.f32 %v1461_v5, %v1557_v1 }
 0x1c7   :  { %v1056_v4 = vpop.eup %1055  ;;  %v541_v13 = vmul.f32 1.442695, %v521_v12  ;;  %v769_v12 = vmul.f32 %v1396_v40, %v1456_v2  ;;  %v773_v40 = vmul.f32 %v1407_v45, %v1507_v26 }
 0x1c8   :  { %583 = vadd.xlane.f32.xlu1 %v1056_v4  ;;  %v1058_v0 = vpop.eup %1057 }
 0x1cc   :  { %v1559_v6 = vpop.xlane.xlu1 %505  ;;  %v1561_v7 = vpop.xlane.xlu2 %783 }
 0x1cd   :  { %v527_v61 = vsub.f32 %v1456_v2, %v1559_v6 }
 0x1ce   :  { %v1565_v9 = vpop.xlane.xlu0 %785 }
 0x1cf   :  { %v553_v10 = vmul.f32 1.442695, %v527_v61 }
 0x1d0   :  { %571 = vadd.xlane.f32.xlu1 %v1058_v0 }
 0x1d1   :  { %1059 = vpow2.f32 %v553_v10 }
 0x1d2   :  { %1061 = vpow2.f32 %v541_v13  ;;  %v771_v13 = vmul.f32 %v1379_v31, %v1484_v16  ;;  %v772_v31 = vmul.f32 %v1404_v44, %v1497_v24 }
 0x1d4   :  { %v1569_v14 = vpop.xlane.xlu2 %507 }
 0x1d5   :  { %v528_v15 = vsub.f32 %v1469_v8, %v1569_v14 }
 0x1d6   :  { %v1573_v17 = vpop.xlane.xlu0 %509  ;;  %v1575_v19 = vpop.xlane.xlu1 %787 }
 0x1d7   :  { %v1060_v20 = vpop.eup %1059  ;;  %v555_v22 = vmul.f32 1.442695, %v528_v15  ;;  %v529_v21 = vsub.f32 %v1484_v16, %v1573_v17 }
 0x1d8   :  { %585 = vadd.xlane.f32.xlu2 %v1060_v20  ;;  %v1062_v30 = vpop.eup %1061 }
 0x1d9   :  { %1063 = vpow2.f32 %v555_v22  ;;  %v557_v5 = vmul.f32 1.442695, %v529_v21 }
 0x1db   :  { %1065 = vpow2.f32 %v557_v5 }
 0x1dc   :  { %v1579_v25 = vpop.xlane.xlu2 %495 }
 0x1dd   :  { %v522_v28 = vsub.f32 %v1476_v11, %v1579_v25 }
 0x1de   :  { %v1583_v32 = vpop.xlane.xlu0 %497  ;;  %v1585_v33 = vpop.xlane.xlu1 %511 }
 0x1df   :  { %v1064_v38 = vpop.eup %1063  ;;  %v543_v39 = vmul.f32 1.442695, %v522_v28  ;;  %v523_v35 = vsub.f32 %v1490_v18, %v1583_v32  ;;  %v530_v27 = vsub.f32 %v1497_v24, %v1585_v33 }
 0x1e0   :  { %573 = vadd.xlane.f32.xlu2 %v1062_v30  ;;  %587 = vadd.xlane.f32.xlu0 %v1064_v38 }
 0x1e1   :  { %v1066_v46 = vpop.eup %1065  ;;  %1067 = vpow2.f32 %v543_v39  ;;  %v545_v36 = vmul.f32 1.442695, %v523_v35  ;;  %v559_v48 = vmul.f32 1.442695, %v530_v27 }
 0x1e2   :  { %589 = vadd.xlane.f32.xlu1 %v1066_v46 }
 0x1e3   :  { %1069 = vpow2.f32 %v545_v36 }
 0x1e4   :  { %1071 = vpow2.f32 %v559_v48  ;;  %v1591_v11 = vpop.xlane.xlu2 %513 }
 0x1e5   :  { %v531_v51 = vsub.f32 %v1507_v26, %v1591_v11 }
 0x1e6   :  { %v1595_v53 = vpop.xlane.xlu1 %499 }
 0x1e7   :  { %v1068_v18 = vpop.eup %1067  ;;  %v561_v52 = vmul.f32 1.442695, %v531_v51  ;;  %v524_v55 = vsub.f32 %v1502_v23, %v1595_v53  ;;  %v770_v23 = vmul.f32 %v1399_v41, %v1469_v8  ;;  %v774_v41 = vmul.f32 %v1391_v37, %v1514_v29 }
 0x1e8   :  { %575 = vadd.xlane.f32.xlu0 %v1068_v18  ;;  %v1599_v54 = vpop.xlane.xlu0 %515 }
 0x1e9   :  { %v1070_v60 = vpop.eup %1069  ;;  %1073 = vpow2.f32 %v561_v52  ;;  %v547_v57 = vmul.f32 1.442695, %v524_v55  ;;  %v532_v62 = vsub.f32 %v1514_v29, %v1599_v54 }
 0x1ea   :  { %v1072_v3 = vpop.eup %1071  ;;  %577 = vadd.xlane.f32.xlu1 %v1070_v60 }
 0x1eb   :  { %1075 = vpow2.f32 %v547_v57  ;;  %v563_v4 = vmul.f32 1.442695, %v532_v62  ;;  %591 = vadd.xlane.f32.xlu2 %v1072_v3 }
 0x1ec   :  { %v1621_v8 = vpop.xlane.xlu2 %789 }
 0x1ed   :  { %1077 = vpow2.f32 %v563_v4 }
 0x1ee   :  { %v794_v2 = vpop.xlane.xlu1 %793 }
 0x1ef   :  { %v1074_v61 = vpop.eup %1073 }
 0x1f0   :  { %593 = vadd.xlane.f32.xlu0 %v1074_v61  ;;  %v792_v15 = vpop.xlane.xlu0 %791 }
 0x1f1   :  { %v1076_v0 = vpop.eup %1075 }
 0x1f3   :  { %v1078_v10 = vpop.eup %1077  ;;  %579 = vadd.xlane.f32.xlu2 %v1076_v0 }
 0x1f4   :  { %595 = vadd.xlane.f32.xlu1 %v1078_v10 }
 0x1f8   :  { %797 = vadd.xlane.f32.xlu0 %v770_v23 }
 0x1fb   :  { %795 = vadd.xlane.f32.xlu2 %v769_v12 }
 0x1fc   :  { %799 = vadd.xlane.f32.xlu1 %v771_v13 }
 0x200   :  { %803 = vadd.xlane.f32.xlu0 %v773_v40 }
 0x203   :  { %801 = vadd.xlane.f32.xlu2 %v772_v31 }
 0x204   :  { %805 = vadd.xlane.f32.xlu1 %v774_v41 }
 0x223   :  { %v566_v16 = vpop.xlane.xlu1 %565 }
 0x224   :  { %1079 = vlog2.f32 %v566_v16 }
 0x22a   :  { %v1080_v20 = vpop.eup %1079 }
 0x22b   :  { %v598_v45 = vmul.f32 0.6931472, %v1080_v20  ;;  %v568_v26 = vpop.xlane.xlu2 %567 }
 0x22c   :  { %1081 = vlog2.f32 %v568_v26 }
 0x22d   :  { %v629_v22 = vadd.f32 %v598_v45, %v1525_v34 }
 0x22f   :  { %v807_v44 = vsub.f32 %v629_v22, %v1529_v42  ;;  %v582_v24 = vpop.xlane.xlu0 %581 }
 0x230   :  { %1083 = vlog2.f32 %v582_v24 }
 0x231   :  { %824 = vst.msk [vmem:[%s1719_s8] sm:$0xff] %vm823_vm0, %v807_v44 }
 0x232   :  { %v1082_v37 = vpop.eup %1081 }
 0x233   :  { %v600_v29 = vmul.f32 0.6931472, %v1082_v37 }
 0x235   :  { %v630_v21 = vadd.f32 %v600_v29, %v1531_v43 }
 0x236   :  { %v1084_v5 = vpop.eup %1083 }
 0x237   :  { %v808_v28 = vsub.f32 %v630_v21, %v1539_v49  ;;  %v614_v30 = vmul.f32 0.6931472, %v1084_v5  ;;  %v570_v38 = vpop.xlane.xlu0 %569 }
 0x238   :  { %1085 = vlog2.f32 %v570_v38 }
 0x239   :  { %825 = vst.msk [vmem:[%s1719_s8 + $0x8] sm:$0xff] %vm823_vm0, %v808_v28  ;;  %v637_v34 = vadd.f32 %v614_v30, %v1535_v47 }
 0x23b   :  { %v815_v42 = vsub.f32 %v637_v34, %v792_v15  ;;  %v584_v39 = vpop.xlane.xlu1 %583 }
 0x23c   :  { %1087 = vlog2.f32 %v584_v39 }
 0x23d   :  { %832 = vst.msk [vmem:[%s1719_s8 + $0x40] sm:$0xff] %vm823_vm0, %v815_v42 }
 0x23e   :  { %v1086_v43 = vpop.eup %1085 }
 0x23f   :  { %v602_v49 = vmul.f32 0.6931472, %v1086_v43 }
 0x241   :  { %v631_v35 = vadd.f32 %v602_v49, %v1541_v50 }
 0x242   :  { %v1088_v27 = vpop.eup %1087 }
 0x243   :  { %v809_v46 = vsub.f32 %v631_v35, %v1545_v56  ;;  %v616_v36 = vmul.f32 0.6931472, %v1088_v27  ;;  %v572_v48 = vpop.xlane.xlu1 %571 }
 0x244   :  { %1089 = vlog2.f32 %v572_v48 }
 0x245   :  { %826 = vst.msk [vmem:[%s1719_s8 + $0x10] sm:$0xff] %vm823_vm0, %v809_v46  ;;  %v638_v47 = vadd.f32 %v616_v36, %v1547_v58 }
 0x247   :  { %v816_v51 = vsub.f32 %v638_v47, %v794_v2 }
 0x249   :  { %833 = vst.msk [vmem:[%s1719_s8 + $0x48] sm:$0xff] %vm823_vm0, %v816_v51 }
 0x24a   :  { %v1090_v50 = vpop.eup %1089 }
 0x24b   :  { %v604_v18 = vmul.f32 0.6931472, %v1090_v50  ;;  %v586_v52 = vpop.xlane.xlu2 %585 }
 0x24d   :  { %v632_v56 = vadd.f32 %v604_v18, %v1549_v59 }
 0x24f   :  { %v810_v55 = vsub.f32 %v632_v56, %v1555_v63 }
 0x251   :  { %827 = vst.msk [vmem:[%s1719_s8 + $0x18] sm:$0xff] %vm823_vm0, %v810_v55 }
 0x253   :  { %v574_v60 = vpop.xlane.xlu2 %573  ;;  %v588_v58 = vpop.xlane.xlu0 %587 }
 0x254   :  { %1091 = vlog2.f32 %v574_v60 }
 0x255   :  { %v590_v57 = vpop.xlane.xlu1 %589 }
 0x25a   :  { %v1092_v62 = vpop.eup %1091 }
 0x25b   :  { %v606_v3 = vmul.f32 0.6931472, %v1092_v62  ;;  %v576_v4 = vpop.xlane.xlu0 %575 }
 0x25c   :  { %1093 = vlog2.f32 %v576_v4 }
 0x25d   :  { %v633_v61 = vadd.f32 %v606_v3, %v1557_v1  ;;  %1095 = vlog2.f32 %v588_v58  ;;  %v578_v0 = vpop.xlane.xlu1 %577 }
 0x25e   :  { %v592_v59 = vpop.xlane.xlu2 %591  ;;  %1097 = vlog2.f32 %v578_v0 }
 0x25f   :  { %v811_v63 = vsub.f32 %v633_v61, %v1561_v7  ;;  %1099 = vlog2.f32 %v586_v52 }
 0x260   :  { %1101 = vlog2.f32 %v590_v57 }
 0x261   :  { %828 = vst.msk [vmem:[%s1719_s8 + $0x20] sm:$0xff] %vm823_vm0, %v811_v63 }
 0x262   :  { %v1094_v10 = vpop.eup %1093 }
 0x263   :  { %v1096_v23 = vpop.eup %1095  ;;  %v608_v12 = vmul.f32 0.6931472, %v1094_v10  ;;  %v594_v13 = vpop.xlane.xlu0 %593 }
 0x264   :  { %v1098_v40 = vpop.eup %1097  ;;  %1103 = vlog2.f32 %v594_v13  ;;  %v620_v2 = vmul.f32 0.6931472, %v1096_v23 }
 0x265   :  { %v634_v1 = vadd.f32 %v608_v12, %v1579_v25  ;;  %v610_v31 = vmul.f32 0.6931472, %v1098_v40  ;;  %v1100_v41 = vpop.eup %1099 }
 0x266   :  { %v580_v16 = vpop.xlane.xlu2 %579  ;;  %v1102_v7 = vpop.eup %1101  ;;  %v618_v26 = vmul.f32 0.6931472, %v1100_v41  ;;  %v640_v44 = vadd.f32 %v620_v2, %v1569_v14 }
 0x267   :  { %v812_v15 = vsub.f32 %v634_v1, %v1565_v9  ;;  %v635_v20 = vadd.f32 %v610_v31, %v1583_v32  ;;  %1105 = vlog2.f32 %v580_v16  ;;  %v596_v45 = vpop.xlane.xlu1 %595  ;;  %v622_v22 = vmul.f32 0.6931472, %v1102_v7 }
 0x268   :  { %1107 = vlog2.f32 %v592_v59  ;;  %v639_v29 = vadd.f32 %v618_v26, %v1559_v6 }
 0x269   :  { %829 = vst.msk [vmem:[%s1719_s8 + $0x28] sm:$0xff] %vm823_vm0, %v812_v15  ;;  %v813_v25 = vsub.f32 %v635_v20, %v1575_v19  ;;  %1109 = vlog2.f32 %v596_v45  ;;  %v641_v19 = vadd.f32 %v622_v22, %v1573_v17 }
 0x26a   :  { %v1104_v24 = vpop.eup %1103 }
 0x26b   :  { %830 = vst.msk [vmem:[%s1719_s8 + $0x30] sm:$0xff] %vm823_vm0, %v813_v25  ;;  %v798_v9 = vpop.xlane.xlu0 %797  ;;  %v626_v5 = vmul.f32 0.6931472, %v1104_v24 }
 0x26c   :  { %v818_v32 = vsub.f32 %v640_v44, %v798_v9 }
 0x26d   :  { %v1106_v37 = vpop.eup %1105  ;;  %v643_v17 = vadd.f32 %v626_v5, %v1591_v11 }
 0x26e   :  { %v1108_v21 = vpop.eup %1107  ;;  %v612_v28 = vmul.f32 0.6931472, %v1106_v37  ;;  %835 = vst.msk [vmem:[%s1719_s8 + $0x58] sm:$0xff] %vm823_vm0, %v818_v32  ;;  %v796_v14 = vpop.xlane.xlu2 %795 }
 0x26f   :  { %v1110_v30 = vpop.eup %1109  ;;  %v817_v38 = vsub.f32 %v639_v29, %v796_v14  ;;  %v800_v34 = vpop.xlane.xlu1 %799  ;;  %v624_v43 = vmul.f32 0.6931472, %v1108_v21 }
 0x270   :  { %v636_v42 = vadd.f32 %v612_v28, %v1595_v53  ;;  %v819_v39 = vsub.f32 %v641_v19, %v800_v34  ;;  %v628_v49 = vmul.f32 0.6931472, %v1110_v30 }
 0x271   :  { %834 = vst.msk [vmem:[%s1719_s8 + $0x50] sm:$0xff] %vm823_vm0, %v817_v38  ;;  %v642_v27 = vadd.f32 %v624_v43, %v1585_v33 }
 0x272   :  { %v814_v6 = vsub.f32 %v636_v42, %v1621_v8  ;;  %836 = vst.msk [vmem:[%s1719_s8 + $0x60] sm:$0xff] %vm823_vm0, %v819_v39  ;;  %v644_v46 = vadd.f32 %v628_v49, %v1599_v54 }
 0x273   :  { %v804_v35 = vpop.xlane.xlu0 %803 }
 0x274   :  { %831 = vst.msk [vmem:[%s1719_s8 + $0x38] sm:$0xff] %vm823_vm0, %v814_v6  ;;  %v821_v53 = vsub.f32 %v643_v17, %v804_v35 }
 0x276   :  { %838 = vst.msk [vmem:[%s1719_s8 + $0x70] sm:$0xff] %vm823_vm0, %v821_v53  ;;  %v802_v8 = vpop.xlane.xlu2 %801 }
 0x277   :  { %v820_v36 = vsub.f32 %v642_v27, %v802_v8  ;;  %v806_v48 = vpop.xlane.xlu1 %805 }
 0x278   :  { %v822_v11 = vsub.f32 %v644_v46, %v806_v48 }
 0x279   :  { %837 = vst.msk [vmem:[%s1719_s8 + $0x68] sm:$0xff] %vm823_vm0, %v820_v36 }
 0x27a   :  { %839 = vst.msk [vmem:[%s1719_s8 + $0x78] sm:$0xff] %vm823_vm0, %v822_v11 }
 0x27b   :  { %1185 = dma.done.wait [#allocation5], 2048  }
 0x27c   :  { %1186 = vsyncadd [#allocation5], 4294965248 }
 0x27d   :  { %1187 = dma.done.wait [#allocation8], 2048  }
 0x27e   :  { %1188 = vsyncadd [#allocation8], 4294965248 }
 0x27f   :  { %878 = vsyncpa [#allocation4], 1 }
 0x280   :  { %879 = vsyncpa [#allocation5], 1 }
 0x281   :  { %880 = vsyncpa [#allocation8], 1 }

</bundles_post_ra>
